<compile_context>
chip_gen: v5e
topology: v5e:2x2
jax: 0.10.0
libtpu: 0.0.40
codegen_flags: <defaults>
</compile_context>

<pallas_src>
import functools

import jax
import jax.numpy as jnp
from jax.experimental import pallas as pl
from jax.experimental.pallas import tpu as pltpu


def _policy_kernel(xT_ref, w1_ref, b1_ref, w2_ref, b2_ref, out_ref):
    # Tile shapes (batch on the lane axis):
    #   xT : (D_in, TB) f32   w1 : (H, D_in) bf16   b1 : (H, 1) f32
    #   w2 : (D_out, H) bf16  b2 : (D_out, 1) f32   out: (D_out, TB) f32
    xT = xT_ref[...].astype(jnp.bfloat16)

    # fc1 + ReLU : (H, D_in) @ (D_in, TB) -> (H, TB).  bf16 MXU inputs, f32 accumulation.
    h = jnp.dot(w1_ref[...], xT, preferred_element_type=jnp.float32) + b1_ref[...]
    h = jnp.maximum(h, 0.0)

    # fc2 : (D_out, H) @ (H, TB) -> (D_out, TB).
    logits = jnp.dot(
        w2_ref[...], h.astype(jnp.bfloat16), preferred_element_type=jnp.float32
    ) + b2_ref[...]

    # Numerically-stable softmax over the (tiny, size-2) feature axis; batch stays
    # lane-dense so the store is an unmasked vst.
    m = jnp.max(logits, axis=0, keepdims=True)
    e = jnp.exp(logits - m)
    denom = jnp.sum(e, axis=0, keepdims=True)
    out_ref[...] = (e * pl.reciprocal(denom, approx=True)).astype(out_ref.dtype)


@functools.partial(jax.jit, static_argnames=("block_b",))
def policy_network_forward(x, w1, b1, w2, b2, *, block_b=128):
    """softmax(relu(x @ w1.T + b1) @ w2.T + b2, axis=-1).

    x: (B, D_in) f32.  PyTorch-native parameter layout: w1 (H, D_in), b1 (H,),
    w2 (D_out, H), b2 (D_out,).  Returns (B, D_out) f32 probabilities.
    block_b must be a multiple of 128; raise to 512-1024 for large batches.
    """
    B, D_in = x.shape
    H, _ = w1.shape
    D_out, _ = w2.shape

    # Pad the batch to a multiple of the tile and put it on the lane axis.
    b_pad128 = pl.cdiv(B, 128) * 128
    tb = min(block_b, b_pad128)            # don't pad tiny batches up to a huge tile
    B_pad = pl.cdiv(B, tb) * tb
    xT = jnp.zeros((D_in, B_pad), x.dtype).at[:, :B].set(x.T)

    # Weights to bf16 once (MXU inputs); biases stay f32 and broadcast over lanes.
    w1_bf = w1.astype(jnp.bfloat16)
    w2_bf = w2.astype(jnp.bfloat16)

    outT = pl.pallas_call(
        _policy_kernel,
        out_shape=jax.ShapeDtypeStruct((D_out, B_pad), jnp.float32),
        grid=(B_pad // tb,),
        in_specs=[
            pl.BlockSpec((D_in, tb), lambda i: (0, i)),   # x tile streams over batch
            pl.BlockSpec((H, D_in), lambda i: (0, 0)),    # weights: constant block index,
            pl.BlockSpec((H, 1), lambda i: (0, 0)),       # DMA'd once, VMEM-resident
            pl.BlockSpec((D_out, H), lambda i: (0, 0)),
            pl.BlockSpec((D_out, 1), lambda i: (0, 0)),
        ],
        out_specs=pl.BlockSpec((D_out, tb), lambda i: (0, i)),
        compiler_params=pltpu.CompilerParams(
            dimension_semantics=("parallel",),            # v7x: shard batch over both TCs
        ),
    )(xT, w1_bf, b1.reshape(H, 1), w2_bf, b2.reshape(D_out, 1))

    return outT[:, :B].T


def init_params(key, input_dim, hidden_dim, output_dim):
    """nn.Linear-default init, PyTorch-native (out, in) weight layout."""
    k1, k2, k3, k4 = jax.random.split(key, 4)
    lim1 = 1.0 / jnp.sqrt(jnp.float32(input_dim))
    lim2 = 1.0 / jnp.sqrt(jnp.float32(hidden_dim))
    w1 = jax.random.uniform(k1, (hidden_dim, input_dim), jnp.float32, -lim1, lim1)
    b1 = jax.random.uniform(k2, (hidden_dim,), jnp.float32, -lim1, lim1)
    w2 = jax.random.uniform(k3, (output_dim, hidden_dim), jnp.float32, -lim2, lim2)
    b2 = jax.random.uniform(k4, (output_dim,), jnp.float32, -lim2, lim2)
    return w1, b1, w2, b2


if __name__ == "__main__":
    key = jax.random.PRNGKey(0)
    input_dim, hidden_dim, output_dim = 4, 64, 2
    batch = 256  # two 128-wide batch tiles -> exercises the grid / double-buffering

    kx, kp = jax.random.split(key)
    x = jax.random.normal(kx, (batch, input_dim), jnp.float32)
    w1, b1, w2, b2 = init_params(kp, input_dim, hidden_dim, output_dim)

    probs = policy_network_forward(x, w1, b1, w2, b2)
    jax.block_until_ready(probs)

    # Reference with the same bf16-input / f32-accumulate matmul contract.
    bf = lambda a: a.astype(jnp.bfloat16)
    h_ref = jnp.maximum(
        jnp.dot(bf(x), bf(w1).T, preferred_element_type=jnp.float32) + b1, 0.0)
    logits_ref = jnp.dot(bf(h_ref), bf(w2).T, preferred_element_type=jnp.float32) + b2
    ref = jax.nn.softmax(logits_ref, axis=-1)

    assert probs.shape == (batch, output_dim)
    # approx reciprocal on the softmax denominator -> tolerances relaxed to ~1e-3.
    assert jnp.allclose(probs, ref, atol=5e-3, rtol=5e-3), float(jnp.max(jnp.abs(probs - ref)))
    assert jnp.allclose(jnp.sum(probs, axis=-1), 1.0, atol=5e-3)

    print("KERNEL_OK")
</pallas_src>

<mosaic_0001>
module attributes {stable_mosaic.version = 11 : i64} {
  func.func @_policy_kernel(%arg0: i32, %arg1: memref<4x128xf32, #tpu.memory_space<vmem>>, %arg2: memref<64x4xbf16, #tpu.memory_space<vmem>>, %arg3: memref<64x1xf32, #tpu.memory_space<vmem>>, %arg4: memref<2x64xbf16, #tpu.memory_space<vmem>>, %arg5: memref<2x1xf32, #tpu.memory_space<vmem>>, %arg6: memref<2x128xf32, #tpu.memory_space<vmem>>) attributes {dimension_semantics = [#tpu.dimension_semantics<parallel>], iteration_bounds = array<i64: 2>, scalar_prefetch = 0 : i64, scratch_operands = 0 : i64, tpu.core_type = #tpu.core_type<tc>, window_params = [{transform_indices = @transform_0, window_bounds = array<i64: 4, 128>}, {pipeline_mode = #tpu.pipeline_mode<synchronous>, transform_indices = @transform_1, window_bounds = array<i64: 64, 4>}, {pipeline_mode = #tpu.pipeline_mode<synchronous>, transform_indices = @transform_2, window_bounds = array<i64: 64, 1>}, {pipeline_mode = #tpu.pipeline_mode<synchronous>, transform_indices = @transform_3, window_bounds = array<i64: 2, 64>}, {pipeline_mode = #tpu.pipeline_mode<synchronous>, transform_indices = @transform_4, window_bounds = array<i64: 2, 1>}, {transform_indices = @transform_5, window_bounds = array<i64: 2, 128>}]} {
    %c0 = arith.constant 0 : index
    %c0_0 = arith.constant 0 : index
    %0 = vector.load %arg1[%c0, %c0_0] : memref<4x128xf32, #tpu.memory_space<vmem>>, vector<4x128xf32>
    %1 = arith.truncf %0 : vector<4x128xf32> to vector<4x128xbf16>
    %c0_1 = arith.constant 0 : index
    %c0_2 = arith.constant 0 : index
    %2 = vector.load %arg2[%c0_1, %c0_2] : memref<64x4xbf16, #tpu.memory_space<vmem>>, vector<64x4xbf16>
    %cst = arith.constant dense<0.000000e+00> : vector<64x128xf32>
    %3 = tpu.matmul %2, %1, %cst {dimension_numbers = #tpu.dot_dimension_numbers<[1], [0], [0], [1], [0, 0, 1, 1], [], []>} : vector<64x4xbf16>, vector<4x128xbf16>, vector<64x128xf32> -> vector<64x128xf32>
    %c0_3 = arith.constant 0 : index
    %c0_4 = arith.constant 0 : index
    %4 = vector.load %arg3[%c0_3, %c0_4] : memref<64x1xf32, #tpu.memory_space<vmem>>, vector<64x1xf32>
    %5 = vector.broadcast %4 : vector<64x1xf32> to vector<64x128xf32>
    %6 = arith.addf %3, %5 : vector<64x128xf32>
    %cst_5 = arith.constant 0.000000e+00 : f32
    %7 = vector.broadcast %cst_5 : f32 to vector<64x128xf32>
    %8 = arith.maximumf %6, %7 : vector<64x128xf32>
    %c0_6 = arith.constant 0 : index
    %c0_7 = arith.constant 0 : index
    %9 = vector.load %arg4[%c0_6, %c0_7] : memref<2x64xbf16, #tpu.memory_space<vmem>>, vector<2x64xbf16>
    %10 = arith.truncf %8 : vector<64x128xf32> to vector<64x128xbf16>
    %cst_8 = arith.constant dense<0.000000e+00> : vector<2x128xf32>
    %11 = tpu.matmul %9, %10, %cst_8 {dimension_numbers = #tpu.dot_dimension_numbers<[1], [0], [0], [1], [0, 0, 1, 1], [], []>} : vector<2x64xbf16>, vector<64x128xbf16>, vector<2x128xf32> -> vector<2x128xf32>
    %c0_9 = arith.constant 0 : index
    %c0_10 = arith.constant 0 : index
    %12 = vector.load %arg5[%c0_9, %c0_10] : memref<2x1xf32, #tpu.memory_space<vmem>>, vector<2x1xf32>
    %13 = vector.broadcast %12 : vector<2x1xf32> to vector<2x128xf32>
    %14 = arith.addf %11, %13 : vector<2x128xf32>
    %cst_11 = arith.constant dense<0xFF800000> : vector<128xf32>
    %15 = vector.multi_reduction <maximumf>, %14, %cst_11 [0] : vector<2x128xf32> to vector<128xf32>
    %16 = vector.shape_cast %15 : vector<128xf32> to vector<1x128xf32>
    %17 = vector.broadcast %16 : vector<1x128xf32> to vector<2x128xf32>
    %18 = arith.subf %14, %17 : vector<2x128xf32>
    %19 = math.exp %18 : vector<2x128xf32>
    %cst_12 = arith.constant dense<0.000000e+00> : vector<128xf32>
    %20 = vector.multi_reduction <add>, %19, %cst_12 [0] : vector<2x128xf32> to vector<128xf32>
    %21 = vector.shape_cast %20 : vector<128xf32> to vector<1x128xf32>
    %22 = tpu.reciprocal %21 {approx = true} : vector<1x128xf32> -> vector<1x128xf32>
    %23 = vector.broadcast %22 : vector<1x128xf32> to vector<2x128xf32>
    %24 = arith.mulf %19, %23 : vector<2x128xf32>
    %c0_13 = arith.constant 0 : index
    %c0_14 = arith.constant 0 : index
    %25 = vector.load %arg6[%c0_13, %c0_14] : memref<2x128xf32, #tpu.memory_space<vmem>>, vector<2x128xf32>
    tpu.vector_store %arg6[%c0_13, %c0_14], %24 {strides = array<i32>} : memref<2x128xf32, #tpu.memory_space<vmem>>, vector<2x128xf32>,
    return
  }
  func.func @transform_0(%arg0: i32) -> (i32, i32) {
    %c0_i32 = arith.constant 0 : i32
    %c0_i32_0 = arith.constant 0 : i32
    return %c0_i32, %arg0 : i32, i32
  }
  func.func @transform_1(%arg0: i32) -> (i32, i32) {
    %c0_i32 = arith.constant 0 : i32
    %c0_i32_0 = arith.constant 0 : i32
    %c0_i32_1 = arith.constant 0 : i32
    return %c0_i32, %c0_i32_0 : i32, i32
  }
  func.func @transform_2(%arg0: i32) -> (i32, i32) {
    %c0_i32 = arith.constant 0 : i32
    %c0_i32_0 = arith.constant 0 : i32
    %c0_i32_1 = arith.constant 0 : i32
    return %c0_i32, %c0_i32_0 : i32, i32
  }
  func.func @transform_3(%arg0: i32) -> (i32, i32) {
    %c0_i32 = arith.constant 0 : i32
    %c0_i32_0 = arith.constant 0 : i32
    %c0_i32_1 = arith.constant 0 : i32
    return %c0_i32, %c0_i32_0 : i32, i32
  }
  func.func @transform_4(%arg0: i32) -> (i32, i32) {
    %c0_i32 = arith.constant 0 : i32
    %c0_i32_0 = arith.constant 0 : i32
    %c0_i32_1 = arith.constant 0 : i32
    return %c0_i32, %c0_i32_0 : i32, i32
  }
  func.func @transform_5(%arg0: i32) -> (i32, i32) {
    %c0_i32 = arith.constant 0 : i32
    %c0_i32_0 = arith.constant 0 : i32
    return %c0_i32, %arg0 : i32, i32
  }
}

</mosaic_0001>

<bundles_post_ra>
// kernel: policy_network_forward.1
= control target key start
LH: loop header
LB: loop body
LE: loop exit
PB: predicated region body
PF: predicated region fallthrough
CT: control target
= control target key end

     0   :  { %10 = vsyncpa [#allocation3], 0  ;;  %s789_s0 = inlined_call_operand.vmem [shape: f32[4,256], index: 0, kind: input, shape index: {}]   ;;  %s790_s1 = inlined_call_operand.vmem [shape: bf16[64,4], index: 1, kind: input, shape index: {}]   ;;  %s791_s2 = inlined_call_operand.vmem [shape: f32[64,1], index: 2, kind: input, shape index: {}]   ;;  %s792_s3 = inlined_call_operand.vmem [shape: bf16[2,64], index: 3, kind: input, shape index: {}]   ;;  %s793_s4 = inlined_call_operand.vmem [shape: f32[2,1], index: 4, kind: input, shape index: {}]   ;;  %s794_s5 = inlined_call_operand.hbm [shape: f32[2,256], index: 5, kind: output, shape index: {}]  }
   0x1   :  { %12 = vsyncpa [#allocation3 + $0x1], 0  ;;  %s655_s18 = smov 0   ;;  %s657_s19 = smov 0  }
   0x2   :  { %s659_s20 = smov 0   ;;  %s661_s21 = smov 0  }
   0x3 LB: > { %s676_s22 = sadd.s32 4294967295, %s622_s21   ;;  %s476_s23 = sadd.s32 4294967294, %s622_s21   ;;  %s622_s21 = sphi %s661_s21, %s800_s21   ;;  %s618_s20 = sphi %s659_s20, %s799_s20   ;;  %s614_s19 = sphi %s657_s19, %s798_s19   ;;  %s610_s18 = sphi %s655_s18, %s797_s18  }
   0x4   : > { %s680_s24 = sadd.s32 1, %s622_s21   ;;  %s135_s25 = sadd.s32 1, %s618_s20 }
   0x5   : > { %s132_s26 = ssub.s32 %s622_s21, %s680_s24  ;;  %p145_p0 = scmp.ne.s32.totalorder %s618_s20, %s614_s19 }
   0x6   : > { %p133_p1 = scmp.eq.s32.totalorder %s132_s26, 0  ;;  %p146_p2 = scmp.eq.s32.totalorder %s676_s22, 1 }
   0x7   : > { %p151_p3 = scmp.ne.s32.totalorder %s614_s19, %s610_s18  ;;  %p152_p4 = scmp.eq.s32.totalorder %s476_s23, 1 }
   0x8   : > { %s691_s27 = scalar_select %p133_p1, %s618_s20, %s135_s25  }
   0x9   : > { %p693_p5 = por %p146_p2, %p145_p0  ;;  %p697_p6 = por %p152_p4, %p151_p3 }
   0xa   : > { %p479_p7 = scmp.ge.s32.totalorder %s622_s21, 1  ;;  %p189_p8 = scmp.lt.s32.totalorder %s622_s21, 3 }
   0xc   : > { %p190_p9 = pnand %p479_p7, %p189_p8 }
   0xd   : > { %p216_p10 = scmp.lt.s32.totalorder (!%p190_p9), %s676_s22, 1  ;;  %s213_s6 = sand.u32 (!%p190_p9), 1, %s614_s19  }
   0xe   : > { %193 = sbr.rel (%p190_p9) target bundleno = 380 (0x17c), region = 40  ;;  %s480_s7 = sshll.u32 (!%p190_p9), %s213_s6, 1 }
   0xf   : > { %s504_s8 = sshll.u32 (!%p190_p9), %s676_s22, 1  ;;  %s580_s25 = scalar_lea.hbm (!%p190_p9), %s794_s5, 4 }
  0x10   : > { %s412_s11 = scalar_lea.hbm (!%p190_p9), %s794_s5, %s504_s8 }
  0x11   : > { %s416_s14 = sshll.u32 (!%p190_p9), %s412_s11, 4  ;;  %s417_s14 = int_to_ptr.hbm [resolvable:$true] %s416_s14 }
  0x12   : > { %s574_s16 = sshra.s32 (!%p190_p9), %s417_s14, 4  ;;  %s575_s16 = int_to_ptr.hbm [resolvable:$true] %s574_s16 }
  0x13   : > { %v237_v0 = vld [vmem:[%s791_s2 + $0x30] sm:$0xff]  ;;  %v235_v1 = vld [vmem:[%s791_s2 + $0x20] sm:$0xff]  ;;  %s217_s9 = scalar_select %p216_p10, %s676_s22, 1  ;;  %v624_v2 = vmov 0   ;;  %vm312_vm0 = vcmask 1041408   ;;  %v238_v6 = vld [vmem:[%s791_s2 + $0x38] sm:$0xff] }
  0x14   : > { %554 = vset.pattern.permute.xlu1 %v624_v2  ;;  %553 = vset.pattern.permute.xlu0 %v624_v2  ;;  %v233_v3 = vld [vmem:[%s791_s2 + $0x10] sm:$0xff]  ;;  %v508_v8 = vld [vmem:[%s790_s1 + $0x8] sm:$0xff]  ;;  %v510_v9 = vld [vmem:[%s790_s1 + $0x18] sm:$0xff]  ;;  %vm299_vm1 = vcmask 31744   ;;  %vm364_vm2 = vcmask 523264   ;;  %s576_s17 = scalar_lea.hbm %s575_s16, 2  ;;  %p581_p0 = scmp.lt.s32.totalorder %s575_s16, %s794_s5 }
  0x15   : > { %271 = vperm.xlu0 %553, %v237_v0   ;;  %261 = vperm.xlu1 %554, %v235_v1   ;;  %s481_s12 = sshll.u32 %s217_s9, 2  ;;  %v236_v10 = vld [vmem:[%s791_s2 + $0x28] sm:$0xff]  ;;  %v507_v11 = vld [vmem:[%s790_s1] sm:$0xff]  ;;  %v234_v12 = vld [vmem:[%s791_s2 + $0x18] sm:$0xff]  ;;  %p577_p11 = scmp.ne.s32.totalorder %s575_s16, %s576_s17 }
  0x16   : > { %555 = vset.pattern.permute.xlu2 %v624_v2  ;;  %s219_s15 = scalar_lea.vmem %s789_s0, %s481_s12  ;;  %v231_v13 = vld [vmem:[%s791_s2] sm:$0xff]  ;;  %v232_v14 = vld [vmem:[%s791_s2 + $0x8] sm:$0xff]  ;;  %v509_v16 = vld [vmem:[%s790_s1 + $0x10] sm:$0xff]  ;;  %s215_s12 = scalar_lea.vmem [#allocation2], %s480_s7 }
  0x17   : > { %251 = vperm.xlu2 %555, %v233_v3   ;;  %v221_v4 = vld [vmem:[%s219_s15] sm:$0xf]  ;;  %s414_s13 = sshll.u32 %s215_s12, 4  ;;  %s402_s15 = scalar_lea.sflag [#allocation3], %s213_s6  ;;  %s415_s13 = int_to_ptr.vmem [resolvable:$true] %s414_s13 }
  0x18   : > { %v222_v5 = vpack.c.bf16 %v221_v4, %v221_v4  ;;  %v358_v15 = vld [vmem:[%s793_s4] sm:$0x3]  ;;  %p578_p12 = pnand %p577_p11, %p693_p5  ;;  %p582_p1 = scmp.lt.s32.totalorder %s580_s25, %s576_s17 }
  0x19   : > { %v353_v53 = vld [vmem:[%s792_s3] sm:$0x1] }
  0x1a   : > { %v314_v7 = vsel %vm312_vm0, %v222_v5, 0  ;;  %p579_p13 = pneg %p578_p12  ;;  %p583_p2 = por %p582_p1, %p581_p0 }
  0x1b   : > { %511 = vmatpush.bf16.msra.mxu2 %v314_v7  ;;  %512 = vmatpush.bf16.msra.mxu3 %v314_v7 }
  0x1c   : > { %323 = vmatpush.bf16.msra.mxu0 %v314_v7  ;;  %p584_p3 = pnand %p583_p2, %p579_p13 }
  0x1d   : > { %276 = vperm.xlu0 %553, %v238_v6   ;;  %266 = vperm.xlu1 %554, %v236_v10  }
  0x1e   : > { %499 = vmatmul.msk.bf16.vlgmr.msra.gmra.mxu2 %vm299_vm1, %v508_v8  ;;  %501 = vmatmul.msk.bf16.vlgmr.msra.gmra.mxu3 %vm299_vm1, %v510_v9 }
  0x1f   : > { %498 = vmatmul.msk.bf16.vlgmr.msra.gmra.mxu0 %vm299_vm1, %v507_v11  ;;  %256 = vperm.xlu2 %555, %v234_v12  }
  0x25   : > { %241 = vperm.xlu0 %553, %v231_v13   ;;  %246 = vperm.xlu1 %554, %v232_v14  }
  0x27   : > { %361 = vperm.xlu2 %555, %v358_v15  }
  0x2e   : > { %500 = vmatmul.msk.bf16.gmra.mxu2 %vm299_vm1, %v509_v16 }
  0x71   : > { %v252_v28 = vpop.permute.xlu2 %251 }
  0x79   : > { %v257_v33 = vpop.permute.xlu2 %256 }
  0x81   : > { %v362_v54 = vpop.permute.xlu2 %361 }
  0x87   : > { %v272_v17 = vpop.permute.xlu0 %271  ;;  %v262_v20 = vpop.permute.xlu1 %261 }
  0x8f   : > { %v277_v22 = vpop.permute.xlu0 %276  ;;  %v267_v30 = vpop.permute.xlu1 %266 }
  0x97   : > { %v242_v37 = vpop.permute.xlu0 %241  ;;  %v247_v39 = vpop.permute.xlu1 %246 }
  0x9c   : > { %v325_v31 = vpop.f32.mrf.mxu0 }
  0x9d   : > { %v326_v45 = vadd.f32 %v325_v31, %v242_v37 }
  0x9f   : > { %v345_v49 = vmax.f32 %v326_v45, 0.0 }
  0xa1   : > { %v330_v18 = vpop.f32.mrf.mxu2  ;;  %v340_v19 = vpop.f32.mrf.mxu3 }
  0xa2   : > { %v341_v21 = vadd.f32 %v340_v19, %v272_v17  ;;  %v331_v41 = vadd.f32 %v330_v18, %v252_v28 }
  0xa4   : > { %v351_v25 = vmax.f32 %v341_v21, 0.0  ;;  %v327_v40 = vpop.f32.mrf.mxu0  ;;  %v347_v48 = vmax.f32 %v331_v41, 0.0 }
  0xa5   : > { %v328_v46 = vadd.f32 %v327_v40, %v247_v39 }
  0xa7   : > { %v346_v50 = vmax.f32 %v328_v46, 0.0 }
  0xa9   : > { %v332_v23 = vpop.f32.mrf.mxu2  ;;  %v342_v24 = vpop.f32.mrf.mxu3  ;;  %v354_v52 = vpack.c.bf16 %v346_v50, %v345_v49 }
  0xaa   : > { %v343_v26 = vadd.f32 %v342_v24, %v277_v22  ;;  %v333_v36 = vadd.f32 %v332_v23, %v257_v33 }
  0xac   : > { %v352_v27 = vmax.f32 %v343_v26, 0.0  ;;  %v348_v44 = vmax.f32 %v333_v36, 0.0 }
  0xae   : > { %v357_v29 = vpack.c.bf16 %v352_v27, %v351_v25  ;;  %v355_v51 = vpack.c.bf16 %v348_v44, %v347_v48 }
  0xb0   : > { %372 = vmatpush.bf16.msra.mxu1 %v357_v29 }
  0xb1   : > { %v335_v32 = vpop.f32.mrf.mxu2 }
  0xb2   : > { %v336_v34 = vadd.f32 %v335_v32, %v262_v20 }
  0xb4   : > { %v349_v42 = vmax.f32 %v336_v34, 0.0 }
  0xb9   : > { %v337_v35 = vpop.f32.mrf.mxu2 }
  0xba   : > { %v338_v38 = vadd.f32 %v337_v35, %v267_v30 }
  0xbc   : > { %v350_v43 = vmax.f32 %v338_v38, 0.0 }
  0xbe   : > { %v356_v47 = vpack.c.bf16 %v350_v43, %v349_v42 }
  0xc0   : > { %373 = vmatpush.bf16.msra.mxu1 %v356_v47 }
  0xc4   : > { %374 = vmatpush.bf16.msra.mxu1 %v355_v51 }
  0xc8   : > { %375 = vmatpush.bf16.msra.mxu1 %v354_v52 }
  0xcb   : > { %502 = vmatmul.msk.bf16.vlgmr.msra.gmra.mxu1 %vm364_vm2, %v353_v53 }
 0x148   : > { %v377_v55 = vpop.f32.mrf.mxu1 }
 0x149   : > { %v378_v56 = vadd.f32 %v377_v55, %v362_v54 }
 0x14b   : > { %v381_v57 = vsel %vm312_vm0, %v378_v56, -inf }
 0x14c   : > { %v382_v58 = vrot.slane %v381_v57, 4 }
 0x14e   : > { %v383_v59 = vmax.f32 %v381_v57, %v382_v58 }
 0x150   : > { %v384_v60 = vrot.slane %v383_v59, 2  ;;  %v379_v61 = vpop.f32.mrf.mxu1 }
 0x152   : > { %v385_v62 = vmax.f32 %v383_v59, %v384_v60 }
 0x154   : > { %v386_v63 = vrot.slane %v385_v62, 1 }
 0x156   : > { %v387_v0 = vmax.f32 %v385_v62, %v386_v63 }
 0x158   : > { %v388_v1 = vsub.f32 %v378_v56, %v387_v0 }
 0x15a   : > { %v389_v2 = vmul.f32 1.442695, %v388_v1 }
 0x15c   : > { %556 = vpow2.f32 %v389_v2 }
 0x162   : > { %v557_v3 = vpop.eup %556 }
 0x163   : > { %v391_v4 = vsel %vm312_vm0, %v557_v3, 0.0 }
 0x164   : > { %v392_v5 = vrot.slane %v391_v4, 4 }
 0x166   : > { %v393_v6 = vadd.f32 %v392_v5, %v391_v4 }
 0x168   : > { %v394_v7 = vrot.slane %v393_v6, 2 }
 0x16a   : > { %v395_v8 = vadd.f32 %v394_v7, %v393_v6 }
 0x16c   : > { %v396_v9 = vrot.slane %v395_v8, 1 }
 0x16e   : > { %v397_v10 = vadd.f32 %v396_v9, %v395_v8 }
 0x170   : > { %558 = vrcp.f32 %v397_v10 }
 0x176   : > { %v559_v11 = vpop.eup %558 }
 0x177   : > { %v399_v12 = vmul.f32 %v559_v11, %v557_v3 }
 0x179   : > { %400 = vst [vmem:[%s215_s12] sm:$0x3] %v399_v12 }
 0x17a   : > { %587 = shalt.err (!%p584_p3)
}
 0x17b   : > { %513 = dma.vmem_to_hbm [thread:$0]  (%p693_p5), %s415_s13, 32, %s417_s14, %s402_s15  }
 0x17c PF: > { %p519_p4 = scmp.ge.s32.totalorder %s622_s21, 2  ;;  %s428_s6 = sand.u32 1, %s610_s18  }
 0x17d   : > { %s429_s7 = scalar_lea.sflag [#allocation3], %s428_s6 }
 0x17e   : > { %p516_p7 = pnand %p519_p4, %p697_p6 }
 0x180   : > { %p517_p8 = pneg %p516_p7 }
 0x182   : > { %605 = dma.done.wait (%p517_p8), %s429_s7, 32  }
 0x183   : > { %607 = vsyncadd (%p517_p8), %s429_s7, 4294967264  ;;  %p15_p9 = scmp.ge.s32.totalorder %s680_s24, 4   ;;  %s797_s18 = smov %s614_s19 }
 0x184   : > { %s798_s19 = smov %s618_s20  ;;  %s799_s20 = smov %s691_s27 }
 0x185   : > { %s800_s21 = smov %s680_s24  ;;  %17 = sbr.rel (!%p15_p9) target bundleno = 3 (0x3), region = 75 }
 0x18a   :  { %435 = vsyncpa [#allocation3], 1 }
 0x18b   :  { %437 = vsyncpa [#allocation3 + $0x1], 1 }

</bundles_post_ra>
